<compile_context>
chip_gen: v7x
topology: tpu7x:2x2x1
jax: 0.10.0
libtpu: 0.0.40
codegen_flags: <defaults>
</compile_context>

<pallas_src>
import functools

import jax
import jax.numpy as jnp
from jax import lax
from jax.experimental import pallas as pl
from jax.experimental.pallas import tpu as pltpu


def _binary_conv_kernel(w_ref, p_ref, o_ref):
    """One MXU contraction per grid step.

    w_ref: (O, K)      pre-binarized weights, compute dtype
    p_ref: (K, NB*P)   lane-dense im2col patches, compute dtype
    o_ref: (O, NB*P)   lane-dense output, f32
    """
    o_ref[...] = lax.dot_general(
        w_ref[...], p_ref[...],
        dimension_numbers=(((1,), (0,)), ((), ())),
        preferred_element_type=jnp.float32,
    ).astype(o_ref.dtype)


def _default_batch_block(n):
    """N on single-TC chips (v5e/v6e); N // num_cores on dual-TC v7x."""
    num_tc = 1
    try:
        kind = jax.devices()[0].device_kind.lower()
        if "v7" in kind:
            num_tc = 2
    except Exception:  # non-TPU backend during tracing/testing
        num_tc = 1
    bb = max(1, n // num_tc)
    while n % bb:
        bb -= 1
    return bb


@functools.partial(
    jax.jit,
    static_argnames=("stride", "padding", "batch_block", "compute_dtype"))
def binary_conv2d(x_nchw, weight_oihw, stride=1, padding=0, batch_block=None,
                  compute_dtype=jnp.bfloat16):
    """Forward of BinaryConv2d. x: (N, C, H, W), weight: (O, C, KH, KW).

    compute_dtype=bfloat16 (default) rounds the *activations* to bf16 before
    the MXU (weights +-1/0 are exact); pass jnp.float32 for a bit-exact path.
    """
    N, C, H, W = x_nchw.shape
    O, _, KH, KW = weight_oihw.shape
    OH = (H + 2 * padding - KH) // stride + 1
    OW = (W + 2 * padding - KW) // stride + 1
    P = OH * OW
    K = C * KH * KW

    if batch_block is None:
        NB = _default_batch_block(N)
        # Keep the lane block a multiple of 128 (else widen to the full batch,
        # which is always a legal full-extent block).
        if (NB * P) % 128 != 0:
            NB = N
    else:
        if N % batch_block != 0:
            raise ValueError(
                f"batch_block={batch_block} must divide batch size N={N}")
        NB = batch_block
        if NB != N and (NB * P) % 128 != 0:
            raise ValueError(
                f"batch_block={NB} gives a lane block of {NB * P} "
                f"(= batch_block * OH * OW), which is neither a multiple of "
                f"128 nor the full lane extent {N * P}")
    NBP = NB * P

    # ---- Wrapper-side glue (XLA): binarize weight once, im2col lane-dense ---
    # Weight: (O, C, KH, KW) -> sign -> (O, K), K-order = (c, kh, kw).
    w = jnp.sign(weight_oihw.astype(jnp.float32)).reshape(O, K)
    w = w.astype(compute_dtype)

    # Patches: (K, N*P) with K-order (c, kh, kw) and lane order (n, oh, ow).
    x = x_nchw.astype(jnp.float32)
    xp = jnp.pad(x, ((0, 0), (0, 0), (padding, padding), (padding, padding)))
    taps = []
    for kh in range(KH):
        for kw in range(KW):
            taps.append(xp[:, :,
                           kh:kh + stride * OH:stride,
                           kw:kw + stride * OW:stride])     # (N, C, OH, OW)
    pat = jnp.stack(taps, axis=2)                            # (N, C, KH*KW, OH, OW)
    pat = jnp.transpose(pat, (1, 2, 0, 3, 4))                # (C, KH*KW, N, OH, OW)
    pat = pat.reshape(K, N * P).astype(compute_dtype)        # (K, N*P)

    out = pl.pallas_call(
        _binary_conv_kernel,
        out_shape=jax.ShapeDtypeStruct((O, N * P), jnp.float32),
        grid=(N // NB,),
        in_specs=[
            pl.BlockSpec((O, K), lambda n: (0, 0)),
            pl.BlockSpec((K, NBP), lambda n: (0, n)),
        ],
        out_specs=pl.BlockSpec((O, NBP), lambda n: (0, n)),
        compiler_params=pltpu.CompilerParams(
            dimension_semantics=("parallel",)),
    )(w, pat)

    # (O, N*P) -> (N, O, OH, OW): one tiny XLA transpose of the final result.
    return jnp.transpose(out.reshape(O, N, OH, OW), (1, 0, 2, 3))


def _reference_conv(x_nchw, weight_oihw, stride, padding):
    """Pure-JAX reference: conv2d with sign-binarized weights."""
    w_bin = jnp.sign(weight_oihw.astype(jnp.float32))
    return lax.conv_general_dilated(
        x_nchw.astype(jnp.float32), w_bin,
        window_strides=(stride, stride),
        padding=((padding, padding), (padding, padding)),
        dimension_numbers=("NCHW", "OIHW", "NCHW"))


if __name__ == "__main__":
    # BinaryConv2d(in_channels=4, out_channels=8, kernel_size=3,
    #              stride=1, padding=1, bias=False)
    N, C, H, W = 2, 4, 16, 16
    O, KH, KW = 8, 3, 3
    stride, padding = 1, 1

    key = jax.random.PRNGKey(0)
    kx, kw_key = jax.random.split(key)
    x = jax.random.normal(kx, (N, C, H, W), dtype=jnp.float32)

    # Deterministic init mimicking nn.Conv2d's kaiming-uniform bound.
    fan_in = C * KH * KW
    bound = 1.0 / (fan_in ** 0.5)
    weight = jax.random.uniform(
        kw_key, (O, C, KH, KW), dtype=jnp.float32, minval=-bound, maxval=bound)
    # bias=False in the module -> no bias term.

    ref = _reference_conv(x, weight, stride, padding)

    # Bit-exact f32 operand path.
    out_f32 = binary_conv2d(x, weight, stride=stride, padding=padding,
                            compute_dtype=jnp.float32)
    out_f32 = jax.block_until_ready(out_f32)
    assert out_f32.shape == ref.shape == (N, O, H, W), (out_f32.shape, ref.shape)
    assert jnp.allclose(out_f32, ref, atol=1e-4, rtol=1e-4), \
        float(jnp.max(jnp.abs(out_f32 - ref)))

    # Default bf16 MXU-operand path (+-1/0 weights exact; only activation
    # rounding differs -> looser tolerance vs the f32 reference).
    out_bf16 = binary_conv2d(x, weight, stride=stride, padding=padding)
    out_bf16 = jax.block_until_ready(out_bf16)
    assert out_bf16.shape == ref.shape
    assert jnp.allclose(out_bf16, ref, atol=1e-1, rtol=5e-2), \
        float(jnp.max(jnp.abs(out_bf16 - ref)))

    # stride=2 path (previously untested).
    ref_s2 = _reference_conv(x, weight, 2, 1)
    out_s2 = binary_conv2d(x, weight, stride=2, padding=1,
                           compute_dtype=jnp.float32)
    out_s2 = jax.block_until_ready(out_s2)
    assert out_s2.shape == ref_s2.shape == (N, O, 8, 8), out_s2.shape
    assert jnp.allclose(out_s2, ref_s2, atol=1e-4, rtol=1e-4), \
        float(jnp.max(jnp.abs(out_s2 - ref_s2)))

    print("KERNEL_OK")
</pallas_src>

<mosaic_0001>
module attributes {stable_mosaic.version = 11 : i64} {
  func.func @_binary_conv_kernel(%arg0: i32, %arg1: memref<8x36xf32, #tpu.memory_space<vmem>>, %arg2: memref<36x512xf32, #tpu.memory_space<vmem>>, %arg3: memref<8x512xf32, #tpu.memory_space<vmem>>) attributes {dimension_semantics = [#tpu.dimension_semantics<parallel>], iteration_bounds = array<i64: 1>, scalar_prefetch = 0 : i64, scratch_operands = 0 : i64, tpu.core_type = #tpu.core_type<tc>, window_params = [{pipeline_mode = #tpu.pipeline_mode<synchronous>, transform_indices = @transform_0, window_bounds = array<i64: 8, 36>}, {transform_indices = @transform_1, window_bounds = array<i64: 36, 512>}, {transform_indices = @transform_2, window_bounds = array<i64: 8, 512>}]} {
    %c0 = arith.constant 0 : index
    %c0_0 = arith.constant 0 : index
    %0 = vector.load %arg1[%c0, %c0_0] : memref<8x36xf32, #tpu.memory_space<vmem>>, vector<8x36xf32>
    %c0_1 = arith.constant 0 : index
    %c0_2 = arith.constant 0 : index
    %1 = vector.load %arg2[%c0_1, %c0_2] : memref<36x512xf32, #tpu.memory_space<vmem>>, vector<36x512xf32>
    %cst = arith.constant dense<0.000000e+00> : vector<8x512xf32>
    %2 = tpu.matmul %0, %1, %cst {dimension_numbers = #tpu.dot_dimension_numbers<[1], [0], [0], [1], [0, 0, 1, 1], [], []>} : vector<8x36xf32>, vector<36x512xf32>, vector<8x512xf32> -> vector<8x512xf32>
    %c0_3 = arith.constant 0 : index
    %c0_4 = arith.constant 0 : index
    %3 = vector.load %arg3[%c0_3, %c0_4] : memref<8x512xf32, #tpu.memory_space<vmem>>, vector<8x512xf32>
    tpu.vector_store %arg3[%c0_3, %c0_4], %2 {strides = array<i32>} : memref<8x512xf32, #tpu.memory_space<vmem>>, vector<8x512xf32>,
    return
  }
  func.func @transform_0(%arg0: i32) -> (i32, i32) {
    %c0_i32 = arith.constant 0 : i32
    %c0_i32_0 = arith.constant 0 : i32
    %c0_i32_1 = arith.constant 0 : i32
    return %c0_i32, %c0_i32_0 : i32, i32
  }
  func.func @transform_1(%arg0: i32) -> (i32, i32) {
    %c0_i32 = arith.constant 0 : i32
    %c0_i32_0 = arith.constant 0 : i32
    return %c0_i32, %arg0 : i32, i32
  }
  func.func @transform_2(%arg0: i32) -> (i32, i32) {
    %c0_i32 = arith.constant 0 : i32
    %c0_i32_0 = arith.constant 0 : i32
    return %c0_i32, %arg0 : i32, i32
  }
}

</mosaic_0001>

<bundles_post_ra>
// kernel: binary_conv2d.1
= control target key start
LH: loop header
LB: loop body
LE: loop exit
PB: predicated region body
PF: predicated region fallthrough
CT: control target
= control target key end

     0   :  { %v222_v3 = vmov 0.0   ;;  %vm36_vm0 = vcmask 1043456   ;;  %vm32_vm1 = vcmask 293888   ;;  %s313_s1 = inlined_call_operand.vmem [shape: f32[36,512], index: 1, kind: input, shape index: {}]   ;;  %s314_s0 = inlined_call_operand.vmem [shape: f32[8,36], index: 0, kind: input, shape index: {}]   ;;  %s315_s2 = inlined_call_operand.vmem [shape: f32[8,512], index: 2, kind: output, shape index: {}]  }
   0x1   :  { %v13_v0 = vld [vmem:[%s313_s1 + $0x8] sm:$0xff]  ;;  %v15_v2 = vld [vmem:[%s313_s1 + $0x18] sm:$0xff]  ;;  %113 = vmatprep.mubr.f32.mxu0 %v222_v3  ;;  %184 = vmatprep.mubr.f32.mxu1 %v222_v3  ;;  %v12_v6 = vld [vmem:[%s313_s1] sm:$0xff] }
   0x2   :  { %v17_v1 = vld [vmem:[%s313_s1 + $0x28] sm:$0xff]  ;;  %v19_v5 = vld [vmem:[%s313_s1 + $0x38] sm:$0xff]  ;;  %v16_v7 = vld [vmem:[%s313_s1 + $0x20] sm:$0xff] }
   0x3   :  { %v205_v4 = vpack.c.bf16 %v17_v1, %v13_v0  ;;  %v213_v8 = vpack.c.bf16 %v19_v5, %v15_v2  ;;  %v207_v9 = vpack.c.bf16 %v16_v7, %v12_v6  ;;  %v14_v10 = vld [vmem:[%s313_s1 + $0x10] sm:$0xff]  ;;  %v21_v12 = vld [vmem:[%s313_s1 + $0x48] sm:$0xff]  ;;  %v23_v15 = vld [vmem:[%s313_s1 + $0x58] sm:$0xff] }
   0x4   :  { %v18_v11 = vld [vmem:[%s313_s1 + $0x30] sm:$0xff]  ;;  %v25_v14 = vld [vmem:[%s313_s1 + $0x68] sm:$0xff]  ;;  %v27_v16 = vld [vmem:[%s313_s1 + $0x78] sm:$0xff] }
   0x5   :  { %206 = vmatprep.subr.bf16.mxu0 %v205_v4  ;;  %v215_v13 = vpack.c.bf16 %v18_v11, %v14_v10  ;;  %214 = vmatprep.subr.bf16.mxu1 %v213_v8  ;;  %v209_v17 = vpack.c.bf16 %v25_v14, %v21_v12  ;;  %v217_v18 = vpack.c.bf16 %v27_v16, %v23_v15  ;;  %v20_v19 = vld [vmem:[%s313_s1 + $0x40] sm:$0xff]  ;;  %v22_v21 = vld [vmem:[%s313_s1 + $0x50] sm:$0xff]  ;;  %v29_v25 = vld [vmem:[%s313_s1 + $0x88] sm:$0xf] }
   0x6   :  { %208 = vmatpush1.bf16.msra.mxu0 %v207_v9  ;;  %v24_v20 = vld [vmem:[%s313_s1 + $0x60] sm:$0xff]  ;;  %v26_v23 = vld [vmem:[%s313_s1 + $0x70] sm:$0xff]  ;;  %v31_v26 = vld [vmem:[%s313_s1 + $0x98] sm:$0xf] }
   0x7   :  { %216 = vmatpush1.bf16.msra.mxu1 %v215_v13  ;;  %v211_v22 = vpack.c.bf16 %v24_v20, %v20_v19  ;;  %210 = vmatprep.subr.bf16.mxu0 %v209_v17  ;;  %v219_v24 = vpack.c.bf16 %v26_v23, %v22_v21  ;;  %v28_v27 = vld [vmem:[%s313_s1 + $0x80] sm:$0xf]  ;;  %v30_v28 = vld [vmem:[%s313_s1 + $0x90] sm:$0xf] }
   0x8   :  { %218 = vmatprep.subr.bf16.mxu1 %v217_v18  ;;  %v11_v29 = vld [vmem:[%s314_s0] sm:$0xff] }
   0xa   :  { %212 = vmatpush1.bf16.msra.mxu0 %v211_v22 }
   0xb   :  { %220 = vmatpush1.bf16.msra.mxu1 %v219_v24  ;;  %199 = vmatprep.subr.msk.mxu0 %vm36_vm0, %v29_v25 }
   0xc   :  { %202 = vmatprep.subr.msk.mxu1 %vm36_vm0, %v31_v26 }
   0xe   :  { %200 = vmatpush1.msk.msra.mxu0 %vm36_vm0, %v28_v27 }
   0xf   :  { %203 = vmatpush1.msk.msra.mxu1 %vm36_vm0, %v30_v28  ;;  %201 = vmatmul.mubr.msk.f32.vlgmr.msra.gmra.mrb[0].mxu0 %vm32_vm1, %v11_v29 }
  0x10   :  { %204 = vmatmul.mubr.msk.f32.vlgmr.msra.gmra.mrb[0].mxu1 %vm32_vm1, %v11_v29 }
  0xe2   :  { %v115_v30 = vpop.f32.mrb[0].mxu0 }
  0xe3   :  { %191 = vst [vmem:[%s315_s2] sm:$0xff] %v115_v30  ;;  %v186_v31 = vpop.f32.mrb[0].mxu1  ;;  %v117_v32 = vpop.f32.mrb[1].mxu0 }
  0xe4   :  { %193 = vst [vmem:[%s315_s2 + $0x10] sm:$0xff] %v186_v31  ;;  %192 = vst [vmem:[%s315_s2 + $0x8] sm:$0xff] %v117_v32  ;;  %v188_v33 = vpop.f32.mrb[1].mxu1 }
  0xe5   :  { %194 = vst [vmem:[%s315_s2 + $0x18] sm:$0xff] %v188_v33 }

</bundles_post_ra>
